<compile_context>
chip_gen: v5e
topology: v5e:2x2
jax: 0.10.0
libtpu: 0.0.40
codegen_flags: <defaults>
</compile_context>

<pallas_src>
import functools

import jax
import jax.numpy as jnp
import numpy as np
from jax.experimental import pallas as pl
from jax.experimental.pallas import tpu as pltpu

NEG_SLOPE = 0.01     # F.leaky_relu default negative_slope
MASK_BIAS = -1e30    # additive bias for non-edges (exp underflows to exactly 0)


def gat_kernel(s_dst_ref, s_src_ref, z_ref, mask_ref, out_ref, m_scr, acc_scr,
               *, num_heads, out_dim):
    """One (dst-tile, src-tile) block for all heads, flash-style online softmax.

    s_dst_ref : (tile_d, H)  f32   dst-side raw attention scores for this dst tile
    s_src_ref : (H, tile_s)  f32   src-side raw attention scores for this src tile
    z_ref     : (H, tile_s, D+1) bf16  per-head z with a ones column (denominator fold)
    mask_ref  : (tile_d, tile_s) int8  adjacency mask block (adj[dst, src] != 0)
    out_ref   : (tile_d, HD_pad) f32   head-concatenated output rows (lane-dense slab)
    m_scr     : (H, tile_d, 1)   f32   running row max per head
    acc_scr   : (H, tile_d, D+1) f32   running [weighted-sum | denom] per head
    """
    j = pl.program_id(1)
    nj = pl.num_programs(1)

    @pl.when(j == 0)
    def _():
        m_scr[...] = jnp.full_like(m_scr, -jnp.inf)
        acc_scr[...] = jnp.zeros_like(acc_scr)

    # int8 mask -> additive f32 bias (0 on edges, -1e30 on non-edges): one convert + fma.
    bias = (1.0 - mask_ref[...].astype(jnp.float32)) * MASK_BIAS        # (tile_d, tile_s)

    for k in range(num_heads):                                          # static unroll; H small
        e = s_dst_ref[:, k:k + 1] + s_src_ref[k:k + 1, :]               # (tile_d, tile_s)
        e = jnp.maximum(e, NEG_SLOPE * e)                               # leaky_relu
        e = e + bias                                                    # non-edges ~ -1e30

        m_old = m_scr[k]                                                # (tile_d, 1)
        m_new = jnp.maximum(m_old, jnp.max(e, axis=-1, keepdims=True))  # always finite
        scale = jnp.exp(m_old - m_new)                                  # rescale old accum
        p = jnp.exp(e - m_new)                                          # non-edges -> 0

        # Aggregation matmul in bf16 with f32 accumulation; the appended ones column of
        # z_ref makes column D of the product the softmax denominator (no XLU row-sum).
        acc_scr[k] = scale * acc_scr[k] + jnp.dot(
            p.astype(jnp.bfloat16), z_ref[k], preferred_element_type=jnp.float32)
        m_scr[k] = m_new

    @pl.when(j == nj - 1)
    def _():
        for k in range(num_heads):
            acc = acc_scr[k]                                            # (tile_d, D+1)
            num = acc[:, :out_dim]
            den = acc[:, out_dim:out_dim + 1]
            inv = pl.reciprocal(den, approx=True)                       # EUP slot
            inv = inv * (2.0 - den * inv)                               # one Newton step
            out_ref[:, k * out_dim:(k + 1) * out_dim] = (num * inv).astype(out_ref.dtype)


def multi_head_gat(h, adj, W, a_src, a_dst, merge="cat", vmem_limit_bytes=None):
    """Multi-head GAT forward.

    h     : (N, in_dim) node features
    adj   : (N, N) dense adjacency, adj[dst, src] != 0 where edge src->dst exists
    W     : (H, out_dim, in_dim)   per-head fc weights (no bias)
    a_src : (H, 1, out_dim)        attn_fc weight half applied to the edge source z
    a_dst : (H, 1, out_dim)        attn_fc weight half applied to the edge destination z
    """
    num_heads, out_dim, in_dim = W.shape
    N = h.shape[0]
    hd = num_heads * out_dim

    # ---- parameter folding + feature matmul HOISTED out of the grid (one XLA matmul) ----
    # Wt columns come out already in torch.cat head-major order; attn_fc halves fold into
    # two extra weight columns per head (a . z == (W^T a) . h).
    Wt = jnp.transpose(W, (2, 0, 1)).reshape(in_dim, hd)                 # (in_dim, H*D)
    w_src = jnp.einsum("hdi,hd->ih", W, a_src[:, 0, :])                  # (in_dim, H)
    w_dst = jnp.einsum("hdi,hd->ih", W, a_dst[:, 0, :])                  # (in_dim, H)
    w_aug = jnp.concatenate([Wt, w_src, w_dst], axis=1)                  # (in_dim, H*D+2H)

    zs = jnp.dot(h.astype(jnp.bfloat16), w_aug.astype(jnp.bfloat16),
                 preferred_element_type=jnp.float32)                     # (N, H*D+2H)
    z = zs[:, :hd]                                                       # (N, H*D)
    s_src_t = zs[:, hd:hd + num_heads].T                                 # (H, N) pre-transposed
    s_dst = zs[:, hd + num_heads:]                                       # (N, H)

    # Per-head z with a ones column so the aggregation matmul also produces the denom.
    z_h = jnp.transpose(z.reshape(N, num_heads, out_dim), (1, 0, 2))     # (H, N, D)
    z_aug = jnp.concatenate([z_h, jnp.ones((num_heads, N, 1), jnp.float32)],
                            axis=-1).astype(jnp.bfloat16)                # (H, N, D+1)

    # int8 adjacency mask (the only O(N^2) HBM stream -> 4x fewer bytes than f32 bias).
    mask = (adj > 0).astype(jnp.int8)                                    # (N, N)

    # ---- tiling: dst rows (parallel, megacore-shardable) x src nodes (streamed) ----
    # Small graphs: one block covering the whole graph.  Large graphs: (512, 1024) blocks
    # keep VMEM O(tile_d*tile_s + tile_s*H*(D+1)) which fits v7x's 64 MiB; v5e/v6e can
    # raise vmem_limit_bytes (~64-100 MB) and enlarge tiles further.
    if N <= 1024:
        tile_d = tile_s = N
    else:
        tile_d, tile_s = 512, 1024
    n_pad = -(-N // tile_s) * tile_s                                     # tile_s % tile_d == 0

    if n_pad != N:
        pad = n_pad - N
        s_dst = jnp.pad(s_dst, ((0, pad), (0, 0)))
        s_src_t = jnp.pad(s_src_t, ((0, 0), (0, pad)))
        z_aug = jnp.pad(z_aug, ((0, 0), (0, pad), (0, 0)))
        mask = jnp.pad(mask, ((0, pad), (0, pad)))                       # padded nodes: no edges

    hd_pad = -(-hd // 128) * 128                                         # lane-dense output slab
    grid = (n_pad // tile_d, n_pad // tile_s)

    kernel = functools.partial(gat_kernel, num_heads=num_heads, out_dim=out_dim)

    out = pl.pallas_call(
        kernel,
        out_shape=jax.ShapeDtypeStruct((n_pad, hd_pad), jnp.float32),
        grid=grid,
        in_specs=[
            pl.BlockSpec((tile_d, num_heads), lambda i, j: (i, 0)),              # s_dst
            pl.BlockSpec((num_heads, tile_s), lambda i, j: (0, j)),              # s_src (H, N)
            pl.BlockSpec((num_heads, tile_s, out_dim + 1), lambda i, j: (0, j, 0)),  # z_aug
            pl.BlockSpec((tile_d, tile_s), lambda i, j: (i, j)),                 # int8 mask
        ],
        out_specs=pl.BlockSpec((tile_d, hd_pad), lambda i, j: (i, 0)),
        scratch_shapes=[
            pltpu.VMEM((num_heads, tile_d, 1), jnp.float32),                     # running max
            pltpu.VMEM((num_heads, tile_d, out_dim + 1), jnp.float32),           # running acc
        ],
        compiler_params=pltpu.CompilerParams(
            # dst tiles are independent -> megacore sharding on v7x; src axis is the
            # online-softmax reduction and must stay "arbitrary".
            dimension_semantics=("parallel", "arbitrary"),
            # Defaults suffice for the test; raise (~64-100 MB on v5e/v6e, <=48 MB on
            # v7x) for whole-graph / larger-tile configurations.
            vmem_limit_bytes=vmem_limit_bytes,
        ),
    )(s_dst, s_src_t, z_aug, mask)

    out = out[:N, :hd]                                  # strip dst-row and lane padding
    if merge == "cat":
        return out                                      # (N, H*out_dim), torch.cat order
    # Original module: torch.mean(torch.stack(head_outs)) -> a scalar.
    return jnp.mean(out)


def reference_multi_head_gat(h, adj, W, a_src, a_dst, merge="cat"):
    """Pure-JAX reference mirroring the PyTorch/DGL semantics head by head."""
    outs = []
    mask = adj > 0
    for k in range(W.shape[0]):
        z = h @ W[k].T                                    # (N, out_dim)
        s_src = z @ a_src[k, 0]                           # (N,)
        s_dst = z @ a_dst[k, 0]                           # (N,)
        e = s_dst[:, None] + s_src[None, :]               # (N_dst, N_src)
        e = jnp.where(e >= 0, e, NEG_SLOPE * e)
        e = jnp.where(mask, e, -jnp.inf)
        alpha = jax.nn.softmax(e, axis=-1)
        outs.append(alpha @ z)
    if merge == "cat":
        return jnp.concatenate(outs, axis=-1)
    return jnp.mean(jnp.stack(outs))


if __name__ == "__main__":
    N, in_dim, out_dim, num_heads = 8, 16, 8, 4

    key = jax.random.PRNGKey(0)
    k_h, k_w, k_a = jax.random.split(key, 3)

    # node features
    h = jax.random.normal(k_h, (N, in_dim), dtype=jnp.float32)

    # deterministic parameters (Linear-like uniform init, no bias)
    bound_fc = 1.0 / np.sqrt(in_dim)
    W = jax.random.uniform(k_w, (num_heads, out_dim, in_dim),
                           minval=-bound_fc, maxval=bound_fc, dtype=jnp.float32)
    bound_attn = 1.0 / np.sqrt(2 * out_dim)
    attn_w = jax.random.uniform(k_a, (num_heads, 1, 2 * out_dim),
                                minval=-bound_attn, maxval=bound_attn, dtype=jnp.float32)
    # attn_fc(cat([src, dst])): first out_dim weights act on src, rest on dst
    a_src = attn_w[:, :, :out_dim]                        # (H, 1, out_dim)
    a_dst = attn_w[:, :, out_dim:]                        # (H, 1, out_dim)

    # deterministic small graph: self-loops + bidirectional ring; adj[dst, src]
    adj_np = np.eye(N, dtype=np.float32)
    for i in range(N):
        adj_np[i, (i + 1) % N] = 1.0
        adj_np[i, (i - 1) % N] = 1.0
    adj = jnp.asarray(adj_np)

    out = multi_head_gat(h, adj, W, a_src, a_dst, merge="cat")
    out = jax.block_until_ready(out)

    ref = reference_multi_head_gat(h, adj, W, a_src, a_dst, merge="cat")
    # Tolerance covers the bf16 MXU operands (f32 accumulation) used for the folded
    # feature matmul and the aggregation matmul; algebra is otherwise identical.
    np.testing.assert_allclose(np.asarray(out), np.asarray(ref),
                               rtol=2e-2, atol=2e-2)
    assert out.shape == (N, num_heads * out_dim)

    print("KERNEL_OK")
</pallas_src>

<mosaic_0001>
module attributes {stable_mosaic.version = 11 : i64} {
  func.func @gat_kernel(%arg0: i32, %arg1: i32, %arg2: memref<8x4xf32, #tpu.memory_space<vmem>>, %arg3: memref<4x8xf32, #tpu.memory_space<vmem>>, %arg4: memref<4x8x9xbf16, #tpu.memory_space<vmem>>, %arg5: memref<8x8xi8, #tpu.memory_space<vmem>>, %arg6: memref<8x128xf32, #tpu.memory_space<vmem>>, %arg7: memref<4x8x1xf32, #tpu.memory_space<vmem>>, %arg8: memref<4x8x9xf32, #tpu.memory_space<vmem>>) attributes {dimension_semantics = [#tpu.dimension_semantics<parallel>, #tpu.dimension_semantics<arbitrary>], iteration_bounds = array<i64: 1, 1>, scalar_prefetch = 0 : i64, scratch_operands = 2 : i64, tpu.core_type = #tpu.core_type<tc>, window_params = [{transform_indices = @transform_0, window_bounds = array<i64: 8, 4>}, {transform_indices = @transform_1, window_bounds = array<i64: 4, 8>}, {transform_indices = @transform_2, window_bounds = array<i64: 4, 8, 9>}, {transform_indices = @transform_3, window_bounds = array<i64: 8, 8>}, {transform_indices = @transform_4, window_bounds = array<i64: 8, 128>}]} {
    %c0_i32 = arith.constant 0 : i32
    %0 = arith.cmpi eq, %arg1, %c0_i32 : i32
    %1 = arith.extui %0 : i1 to i32
    %c0_i32_0 = arith.constant 0 : i32
    %2 = arith.cmpi ne, %1, %c0_i32_0 : i32
    scf.if %2 {
      %cst_90 = arith.constant 0xFF800000 : f32
      %148 = vector.broadcast %cst_90 : f32 to vector<4x8x1xf32>
      %c0_91 = arith.constant 0 : index
      %c0_92 = arith.constant 0 : index
      %c0_93 = arith.constant 0 : index
      %149 = vector.load %arg7[%c0_91, %c0_92, %c0_93] : memref<4x8x1xf32, #tpu.memory_space<vmem>>, vector<4x8x1xf32>
      tpu.vector_store %arg7[%c0_91, %c0_92, %c0_93], %148 {strides = array<i32>} : memref<4x8x1xf32, #tpu.memory_space<vmem>>, vector<4x8x1xf32>,
      %cst_94 = arith.constant 0.000000e+00 : f32
      %150 = vector.broadcast %cst_94 : f32 to vector<4x8x9xf32>
      %c0_95 = arith.constant 0 : index
      %c0_96 = arith.constant 0 : index
      %c0_97 = arith.constant 0 : index
      %151 = vector.load %arg8[%c0_95, %c0_96, %c0_97] : memref<4x8x9xf32, #tpu.memory_space<vmem>>, vector<4x8x9xf32>
      tpu.vector_store %arg8[%c0_95, %c0_96, %c0_97], %150 {strides = array<i32>} : memref<4x8x9xf32, #tpu.memory_space<vmem>>, vector<4x8x9xf32>,
    } else {
    }
    %c0 = arith.constant 0 : index
    %c0_1 = arith.constant 0 : index
    %3 = vector.load %arg5[%c0, %c0_1] : memref<8x8xi8, #tpu.memory_space<vmem>>, vector<8x8xi8>
    %4 = arith.sitofp %3 : vector<8x8xi8> to vector<8x8xf32>
    %cst = arith.constant 1.000000e+00 : f32
    %5 = vector.broadcast %cst : f32 to vector<8x8xf32>
    %6 = arith.subf %5, %4 : vector<8x8xf32>
    %cst_2 = arith.constant -1.000000e+30 : f32
    %7 = vector.broadcast %cst_2 : f32 to vector<8x8xf32>
    %8 = arith.mulf %6, %7 : vector<8x8xf32>
    %c0_3 = arith.constant 0 : index
    %c0_4 = arith.constant 0 : index
    %9 = vector.load %arg2[%c0_3, %c0_4] : memref<8x4xf32, #tpu.memory_space<vmem>>, vector<8x1xf32>
    %c0_5 = arith.constant 0 : index
    %c0_6 = arith.constant 0 : index
    %10 = vector.load %arg3[%c0_5, %c0_6] : memref<4x8xf32, #tpu.memory_space<vmem>>, vector<1x8xf32>
    %11 = vector.broadcast %9 : vector<8x1xf32> to vector<8x8xf32>
    %12 = vector.broadcast %10 : vector<1x8xf32> to vector<8x8xf32>
    %13 = arith.addf %11, %12 : vector<8x8xf32>
    %cst_7 = arith.constant 0.00999999977 : f32
    %14 = vector.broadcast %cst_7 : f32 to vector<8x8xf32>
    %15 = arith.mulf %14, %13 : vector<8x8xf32>
    %16 = arith.maximumf %13, %15 : vector<8x8xf32>
    %17 = arith.addf %16, %8 : vector<8x8xf32>
    %c0_8 = arith.constant 0 : index
    %c0_9 = arith.constant 0 : index
    %c0_10 = arith.constant 0 : index
    %18 = vector.load %arg7[%c0_8, %c0_9, %c0_10] : memref<4x8x1xf32, #tpu.memory_space<vmem>>, vector<1x8x1xf32>
    %19 = vector.shape_cast %18 : vector<1x8x1xf32> to vector<8x1xf32>
    %cst_11 = arith.constant dense<0xFF800000> : vector<8xf32>
    %20 = vector.multi_reduction <maximumf>, %17, %cst_11 [1] : vector<8x8xf32> to vector<8xf32>
    %21 = vector.shape_cast %20 : vector<8xf32> to vector<8x1xf32>
    %22 = arith.maximumf %19, %21 : vector<8x1xf32>
    %23 = arith.subf %19, %22 : vector<8x1xf32>
    %24 = math.exp %23 : vector<8x1xf32>
    %25 = vector.broadcast %22 : vector<8x1xf32> to vector<8x8xf32>
    %26 = arith.subf %17, %25 : vector<8x8xf32>
    %27 = math.exp %26 : vector<8x8xf32>
    %c0_12 = arith.constant 0 : index
    %c0_13 = arith.constant 0 : index
    %c0_14 = arith.constant 0 : index
    %28 = vector.load %arg8[%c0_12, %c0_13, %c0_14] : memref<4x8x9xf32, #tpu.memory_space<vmem>>, vector<1x8x9xf32>
    %29 = vector.shape_cast %28 : vector<1x8x9xf32> to vector<8x9xf32>
    %30 = vector.broadcast %24 : vector<8x1xf32> to vector<8x9xf32>
    %31 = arith.mulf %30, %29 : vector<8x9xf32>
    %32 = arith.truncf %27 : vector<8x8xf32> to vector<8x8xbf16>
    %c0_15 = arith.constant 0 : index
    %c0_16 = arith.constant 0 : index
    %c0_17 = arith.constant 0 : index
    %33 = vector.load %arg4[%c0_15, %c0_16, %c0_17] : memref<4x8x9xbf16, #tpu.memory_space<vmem>>, vector<1x8x9xbf16>
    %34 = vector.shape_cast %33 : vector<1x8x9xbf16> to vector<8x9xbf16>
    %cst_18 = arith.constant dense<0.000000e+00> : vector<8x9xf32>
    %35 = tpu.matmul %32, %34, %cst_18 {dimension_numbers = #tpu.dot_dimension_numbers<[1], [0], [0], [1], [0, 0, 1, 1], [], []>} : vector<8x8xbf16>, vector<8x9xbf16>, vector<8x9xf32> -> vector<8x9xf32>
    %36 = arith.addf %31, %35 : vector<8x9xf32>
    %c0_19 = arith.constant 0 : index
    %c0_20 = arith.constant 0 : index
    %c0_21 = arith.constant 0 : index
    %37 = vector.load %arg8[%c0_19, %c0_20, %c0_21] : memref<4x8x9xf32, #tpu.memory_space<vmem>>, vector<1x8x9xf32>
    %38 = vector.shape_cast %37 : vector<1x8x9xf32> to vector<8x9xf32>
    %39 = vector.shape_cast %36 : vector<8x9xf32> to vector<1x8x9xf32>
    tpu.vector_store %arg8[%c0_19, %c0_20, %c0_21], %39 {strides = array<i32>} : memref<4x8x9xf32, #tpu.memory_space<vmem>>, vector<1x8x9xf32>,
    %c0_22 = arith.constant 0 : index
    %c0_23 = arith.constant 0 : index
    %c0_24 = arith.constant 0 : index
    %40 = vector.load %arg7[%c0_22, %c0_23, %c0_24] : memref<4x8x1xf32, #tpu.memory_space<vmem>>, vector<1x8x1xf32>
    %41 = vector.shape_cast %40 : vector<1x8x1xf32> to vector<8x1xf32>
    %42 = vector.shape_cast %22 : vector<8x1xf32> to vector<1x8x1xf32>
    tpu.vector_store %arg7[%c0_22, %c0_23, %c0_24], %42 {strides = array<i32>} : memref<4x8x1xf32, #tpu.memory_space<vmem>>, vector<1x8x1xf32>,
    %c0_25 = arith.constant 0 : index
    %c1 = arith.constant 1 : index
    %43 = vector.load %arg2[%c0_25, %c1] : memref<8x4xf32, #tpu.memory_space<vmem>>, vector<8x1xf32>
    %c1_26 = arith.constant 1 : index
    %c0_27 = arith.constant 0 : index
    %44 = vector.load %arg3[%c1_26, %c0_27] : memref<4x8xf32, #tpu.memory_space<vmem>>, vector<1x8xf32>
    %45 = vector.broadcast %43 : vector<8x1xf32> to vector<8x8xf32>
    %46 = vector.broadcast %44 : vector<1x8xf32> to vector<8x8xf32>
    %47 = arith.addf %45, %46 : vector<8x8xf32>
    %cst_28 = arith.constant 0.00999999977 : f32
    %48 = vector.broadcast %cst_28 : f32 to vector<8x8xf32>
    %49 = arith.mulf %48, %47 : vector<8x8xf32>
    %50 = arith.maximumf %47, %49 : vector<8x8xf32>
    %51 = arith.addf %50, %8 : vector<8x8xf32>
    %c1_29 = arith.constant 1 : index
    %c0_30 = arith.constant 0 : index
    %c0_31 = arith.constant 0 : index
    %52 = vector.load %arg7[%c1_29, %c0_30, %c0_31] : memref<4x8x1xf32, #tpu.memory_space<vmem>>, vector<1x8x1xf32>
    %53 = vector.shape_cast %52 : vector<1x8x1xf32> to vector<8x1xf32>
    %cst_32 = arith.constant dense<0xFF800000> : vector<8xf32>
    %54 = vector.multi_reduction <maximumf>, %51, %cst_32 [1] : vector<8x8xf32> to vector<8xf32>
    %55 = vector.shape_cast %54 : vector<8xf32> to vector<8x1xf32>
    %56 = arith.maximumf %53, %55 : vector<8x1xf32>
    %57 = arith.subf %53, %56 : vector<8x1xf32>
    %58 = math.exp %57 : vector<8x1xf32>
    %59 = vector.broadcast %56 : vector<8x1xf32> to vector<8x8xf32>
    %60 = arith.subf %51, %59 : vector<8x8xf32>
    %61 = math.exp %60 : vector<8x8xf32>
    %c1_33 = arith.constant 1 : index
    %c0_34 = arith.constant 0 : index
    %c0_35 = arith.constant 0 : index
    %62 = vector.load %arg8[%c1_33, %c0_34, %c0_35] : memref<4x8x9xf32, #tpu.memory_space<vmem>>, vector<1x8x9xf32>
    %63 = vector.shape_cast %62 : vector<1x8x9xf32> to vector<8x9xf32>
    %64 = vector.broadcast %58 : vector<8x1xf32> to vector<8x9xf32>
    %65 = arith.mulf %64, %63 : vector<8x9xf32>
    %66 = arith.truncf %61 : vector<8x8xf32> to vector<8x8xbf16>
    %c1_36 = arith.constant 1 : index
    %c0_37 = arith.constant 0 : index
    %c0_38 = arith.constant 0 : index
    %67 = vector.load %arg4[%c1_36, %c0_37, %c0_38] : memref<4x8x9xbf16, #tpu.memory_space<vmem>>, vector<1x8x9xbf16>
    %68 = vector.shape_cast %67 : vector<1x8x9xbf16> to vector<8x9xbf16>
    %cst_39 = arith.constant dense<0.000000e+00> : vector<8x9xf32>
    %69 = tpu.matmul %66, %68, %cst_39 {dimension_numbers = #tpu.dot_dimension_numbers<[1], [0], [0], [1], [0, 0, 1, 1], [], []>} : vector<8x8xbf16>, vector<8x9xbf16>, vector<8x9xf32> -> vector<8x9xf32>
    %70 = arith.addf %65, %69 : vector<8x9xf32>
    %c1_40 = arith.constant 1 : index
    %c0_41 = arith.constant 0 : index
    %c0_42 = arith.constant 0 : index
    %71 = vector.load %arg8[%c1_40, %c0_41, %c0_42] : memref<4x8x9xf32, #tpu.memory_space<vmem>>, vector<1x8x9xf32>
    %72 = vector.shape_cast %71 : vector<1x8x9xf32> to vector<8x9xf32>
    %73 = vector.shape_cast %70 : vector<8x9xf32> to vector<1x8x9xf32>
    tpu.vector_store %arg8[%c1_40, %c0_41, %c0_42], %73 {strides = array<i32>} : memref<4x8x9xf32, #tpu.memory_space<vmem>>, vector<1x8x9xf32>,
    %c1_43 = arith.constant 1 : index
    %c0_44 = arith.constant 0 : index
    %c0_45 = arith.constant 0 : index
    %74 = vector.load %arg7[%c1_43, %c0_44, %c0_45] : memref<4x8x1xf32, #tpu.memory_space<vmem>>, vector<1x8x1xf32>
    %75 = vector.shape_cast %74 : vector<1x8x1xf32> to vector<8x1xf32>
    %76 = vector.shape_cast %56 : vector<8x1xf32> to vector<1x8x1xf32>
    tpu.vector_store %arg7[%c1_43, %c0_44, %c0_45], %76 {strides = array<i32>} : memref<4x8x1xf32, #tpu.memory_space<vmem>>, vector<1x8x1xf32>,
    %c0_46 = arith.constant 0 : index
    %c2 = arith.constant 2 : index
    %77 = vector.load %arg2[%c0_46, %c2] : memref<8x4xf32, #tpu.memory_space<vmem>>, vector<8x1xf32>
    %c2_47 = arith.constant 2 : index
    %c0_48 = arith.constant 0 : index
    %78 = vector.load %arg3[%c2_47, %c0_48] : memref<4x8xf32, #tpu.memory_space<vmem>>, vector<1x8xf32>
    %79 = vector.broadcast %77 : vector<8x1xf32> to vector<8x8xf32>
    %80 = vector.broadcast %78 : vector<1x8xf32> to vector<8x8xf32>
    %81 = arith.addf %79, %80 : vector<8x8xf32>
    %cst_49 = arith.constant 0.00999999977 : f32
    %82 = vector.broadcast %cst_49 : f32 to vector<8x8xf32>
    %83 = arith.mulf %82, %81 : vector<8x8xf32>
    %84 = arith.maximumf %81, %83 : vector<8x8xf32>
    %85 = arith.addf %84, %8 : vector<8x8xf32>
    %c2_50 = arith.constant 2 : index
    %c0_51 = arith.constant 0 : index
    %c0_52 = arith.constant 0 : index
    %86 = vector.load %arg7[%c2_50, %c0_51, %c0_52] : memref<4x8x1xf32, #tpu.memory_space<vmem>>, vector<1x8x1xf32>
    %87 = vector.shape_cast %86 : vector<1x8x1xf32> to vector<8x1xf32>
    %cst_53 = arith.constant dense<0xFF800000> : vector<8xf32>
    %88 = vector.multi_reduction <maximumf>, %85, %cst_53 [1] : vector<8x8xf32> to vector<8xf32>
    %89 = vector.shape_cast %88 : vector<8xf32> to vector<8x1xf32>
    %90 = arith.maximumf %87, %89 : vector<8x1xf32>
    %91 = arith.subf %87, %90 : vector<8x1xf32>
    %92 = math.exp %91 : vector<8x1xf32>
    %93 = vector.broadcast %90 : vector<8x1xf32> to vector<8x8xf32>
    %94 = arith.subf %85, %93 : vector<8x8xf32>
    %95 = math.exp %94 : vector<8x8xf32>
    %c2_54 = arith.constant 2 : index
    %c0_55 = arith.constant 0 : index
    %c0_56 = arith.constant 0 : index
    %96 = vector.load %arg8[%c2_54, %c0_55, %c0_56] : memref<4x8x9xf32, #tpu.memory_space<vmem>>, vector<1x8x9xf32>
    %97 = vector.shape_cast %96 : vector<1x8x9xf32> to vector<8x9xf32>
    %98 = vector.broadcast %92 : vector<8x1xf32> to vector<8x9xf32>
    %99 = arith.mulf %98, %97 : vector<8x9xf32>
    %100 = arith.truncf %95 : vector<8x8xf32> to vector<8x8xbf16>
    %c2_57 = arith.constant 2 : index
    %c0_58 = arith.constant 0 : index
    %c0_59 = arith.constant 0 : index
    %101 = vector.load %arg4[%c2_57, %c0_58, %c0_59] : memref<4x8x9xbf16, #tpu.memory_space<vmem>>, vector<1x8x9xbf16>
    %102 = vector.shape_cast %101 : vector<1x8x9xbf16> to vector<8x9xbf16>
    %cst_60 = arith.constant dense<0.000000e+00> : vector<8x9xf32>
    %103 = tpu.matmul %100, %102, %cst_60 {dimension_numbers = #tpu.dot_dimension_numbers<[1], [0], [0], [1], [0, 0, 1, 1], [], []>} : vector<8x8xbf16>, vector<8x9xbf16>, vector<8x9xf32> -> vector<8x9xf32>
    %104 = arith.addf %99, %103 : vector<8x9xf32>
    %c2_61 = arith.constant 2 : index
    %c0_62 = arith.constant 0 : index
    %c0_63 = arith.constant 0 : index
    %105 = vector.load %arg8[%c2_61, %c0_62, %c0_63] : memref<4x8x9xf32, #tpu.memory_space<vmem>>, vector<1x8x9xf32>
    %106 = vector.shape_cast %105 : vector<1x8x9xf32> to vector<8x9xf32>
    %107 = vector.shape_cast %104 : vector<8x9xf32> to vector<1x8x9xf32>
    tpu.vector_store %arg8[%c2_61, %c0_62, %c0_63], %107 {strides = array<i32>} : memref<4x8x9xf32, #tpu.memory_space<vmem>>, vector<1x8x9xf32>,
    %c2_64 = arith.constant 2 : index
    %c0_65 = arith.constant 0 : index
    %c0_66 = arith.constant 0 : index
    %108 = vector.load %arg7[%c2_64, %c0_65, %c0_66] : memref<4x8x1xf32, #tpu.memory_space<vmem>>, vector<1x8x1xf32>
    %109 = vector.shape_cast %108 : vector<1x8x1xf32> to vector<8x1xf32>
    %110 = vector.shape_cast %90 : vector<8x1xf32> to vector<1x8x1xf32>
    tpu.vector_store %arg7[%c2_64, %c0_65, %c0_66], %110 {strides = array<i32>} : memref<4x8x1xf32, #tpu.memory_space<vmem>>, vector<1x8x1xf32>,
    %c0_67 = arith.constant 0 : index
    %c3 = arith.constant 3 : index
    %111 = vector.load %arg2[%c0_67, %c3] : memref<8x4xf32, #tpu.memory_space<vmem>>, vector<8x1xf32>
    %c3_68 = arith.constant 3 : index
    %c0_69 = arith.constant 0 : index
    %112 = vector.load %arg3[%c3_68, %c0_69] : memref<4x8xf32, #tpu.memory_space<vmem>>, vector<1x8xf32>
    %113 = vector.broadcast %111 : vector<8x1xf32> to vector<8x8xf32>
    %114 = vector.broadcast %112 : vector<1x8xf32> to vector<8x8xf32>
    %115 = arith.addf %113, %114 : vector<8x8xf32>
    %cst_70 = arith.constant 0.00999999977 : f32
    %116 = vector.broadcast %cst_70 : f32 to vector<8x8xf32>
    %117 = arith.mulf %116, %115 : vector<8x8xf32>
    %118 = arith.maximumf %115, %117 : vector<8x8xf32>
    %119 = arith.addf %118, %8 : vector<8x8xf32>
    %c3_71 = arith.constant 3 : index
    %c0_72 = arith.constant 0 : index
    %c0_73 = arith.constant 0 : index
    %120 = vector.load %arg7[%c3_71, %c0_72, %c0_73] : memref<4x8x1xf32, #tpu.memory_space<vmem>>, vector<1x8x1xf32>
    %121 = vector.shape_cast %120 : vector<1x8x1xf32> to vector<8x1xf32>
    %cst_74 = arith.constant dense<0xFF800000> : vector<8xf32>
    %122 = vector.multi_reduction <maximumf>, %119, %cst_74 [1] : vector<8x8xf32> to vector<8xf32>
    %123 = vector.shape_cast %122 : vector<8xf32> to vector<8x1xf32>
    %124 = arith.maximumf %121, %123 : vector<8x1xf32>
    %125 = arith.subf %121, %124 : vector<8x1xf32>
    %126 = math.exp %125 : vector<8x1xf32>
    %127 = vector.broadcast %124 : vector<8x1xf32> to vector<8x8xf32>
    %128 = arith.subf %119, %127 : vector<8x8xf32>
    %129 = math.exp %128 : vector<8x8xf32>
    %c3_75 = arith.constant 3 : index
    %c0_76 = arith.constant 0 : index
    %c0_77 = arith.constant 0 : index
    %130 = vector.load %arg8[%c3_75, %c0_76, %c0_77] : memref<4x8x9xf32, #tpu.memory_space<vmem>>, vector<1x8x9xf32>
    %131 = vector.shape_cast %130 : vector<1x8x9xf32> to vector<8x9xf32>
    %132 = vector.broadcast %126 : vector<8x1xf32> to vector<8x9xf32>
    %133 = arith.mulf %132, %131 : vector<8x9xf32>
    %134 = arith.truncf %129 : vector<8x8xf32> to vector<8x8xbf16>
    %c3_78 = arith.constant 3 : index
    %c0_79 = arith.constant 0 : index
    %c0_80 = arith.constant 0 : index
    %135 = vector.load %arg4[%c3_78, %c0_79, %c0_80] : memref<4x8x9xbf16, #tpu.memory_space<vmem>>, vector<1x8x9xbf16>
    %136 = vector.shape_cast %135 : vector<1x8x9xbf16> to vector<8x9xbf16>
    %cst_81 = arith.constant dense<0.000000e+00> : vector<8x9xf32>
    %137 = tpu.matmul %134, %136, %cst_81 {dimension_numbers = #tpu.dot_dimension_numbers<[1], [0], [0], [1], [0, 0, 1, 1], [], []>} : vector<8x8xbf16>, vector<8x9xbf16>, vector<8x9xf32> -> vector<8x9xf32>
    %138 = arith.addf %133, %137 : vector<8x9xf32>
    %c3_82 = arith.constant 3 : index
    %c0_83 = arith.constant 0 : index
    %c0_84 = arith.constant 0 : index
    %139 = vector.load %arg8[%c3_82, %c0_83, %c0_84] : memref<4x8x9xf32, #tpu.memory_space<vmem>>, vector<1x8x9xf32>
    %140 = vector.shape_cast %139 : vector<1x8x9xf32> to vector<8x9xf32>
    %141 = vector.shape_cast %138 : vector<8x9xf32> to vector<1x8x9xf32>
    tpu.vector_store %arg8[%c3_82, %c0_83, %c0_84], %141 {strides = array<i32>} : memref<4x8x9xf32, #tpu.memory_space<vmem>>, vector<1x8x9xf32>,
    %c3_85 = arith.constant 3 : index
    %c0_86 = arith.constant 0 : index
    %c0_87 = arith.constant 0 : index
    %142 = vector.load %arg7[%c3_85, %c0_86, %c0_87] : memref<4x8x1xf32, #tpu.memory_space<vmem>>, vector<1x8x1xf32>
    %143 = vector.shape_cast %142 : vector<1x8x1xf32> to vector<8x1xf32>
    %144 = vector.shape_cast %124 : vector<8x1xf32> to vector<1x8x1xf32>
    tpu.vector_store %arg7[%c3_85, %c0_86, %c0_87], %144 {strides = array<i32>} : memref<4x8x1xf32, #tpu.memory_space<vmem>>, vector<1x8x1xf32>,
    %c0_i32_88 = arith.constant 0 : i32
    %145 = arith.cmpi eq, %arg1, %c0_i32_88 : i32
    %146 = arith.extui %145 : i1 to i32
    %c0_i32_89 = arith.constant 0 : i32
    %147 = arith.cmpi ne, %146, %c0_i32_89 : i32
    scf.if %147 {
      %c0_90 = arith.constant 0 : index
      %c0_91 = arith.constant 0 : index
      %c0_92 = arith.constant 0 : index
      %148 = vector.load %arg8[%c0_90, %c0_91, %c0_92] : memref<4x8x9xf32, #tpu.memory_space<vmem>>, vector<1x8x9xf32>
      %149 = vector.shape_cast %148 : vector<1x8x9xf32> to vector<8x9xf32>
      %150 = vector.extract_strided_slice %149 {offsets = [0, 0], sizes = [8, 8], strides = [1, 1]} : vector<8x9xf32> to vector<8x8xf32>
      %151 = vector.extract_strided_slice %149 {offsets = [0, 8], sizes = [8, 1], strides = [1, 1]} : vector<8x9xf32> to vector<8x1xf32>
      %152 = tpu.reciprocal %151 {approx = true} : vector<8x1xf32> -> vector<8x1xf32>
      %153 = arith.mulf %151, %152 : vector<8x1xf32>
      %cst_93 = arith.constant 2.000000e+00 : f32
      %154 = vector.broadcast %cst_93 : f32 to vector<8x1xf32>
      %155 = arith.subf %154, %153 : vector<8x1xf32>
      %156 = arith.mulf %152, %155 : vector<8x1xf32>
      %157 = vector.broadcast %156 : vector<8x1xf32> to vector<8x8xf32>
      %158 = arith.mulf %150, %157 : vector<8x8xf32>
      %c0_94 = arith.constant 0 : index
      %c0_95 = arith.constant 0 : index
      %159 = vector.load %arg6[%c0_94, %c0_95] : memref<8x128xf32, #tpu.memory_space<vmem>>, vector<8x8xf32>
      tpu.vector_store %arg6[%c0_94, %c0_95], %158 {strides = array<i32>} : memref<8x128xf32, #tpu.memory_space<vmem>>, vector<8x8xf32>,
      %c1_96 = arith.constant 1 : index
      %c0_97 = arith.constant 0 : index
      %c0_98 = arith.constant 0 : index
      %160 = vector.load %arg8[%c1_96, %c0_97, %c0_98] : memref<4x8x9xf32, #tpu.memory_space<vmem>>, vector<1x8x9xf32>
      %161 = vector.shape_cast %160 : vector<1x8x9xf32> to vector<8x9xf32>
      %162 = vector.extract_strided_slice %161 {offsets = [0, 0], sizes = [8, 8], strides = [1, 1]} : vector<8x9xf32> to vector<8x8xf32>
      %163 = vector.extract_strided_slice %161 {offsets = [0, 8], sizes = [8, 1], strides = [1, 1]} : vector<8x9xf32> to vector<8x1xf32>
      %164 = tpu.reciprocal %163 {approx = true} : vector<8x1xf32> -> vector<8x1xf32>
      %165 = arith.mulf %163, %164 : vector<8x1xf32>
      %cst_99 = arith.constant 2.000000e+00 : f32
      %166 = vector.broadcast %cst_99 : f32 to vector<8x1xf32>
      %167 = arith.subf %166, %165 : vector<8x1xf32>
      %168 = arith.mulf %164, %167 : vector<8x1xf32>
      %169 = vector.broadcast %168 : vector<8x1xf32> to vector<8x8xf32>
      %170 = arith.mulf %162, %169 : vector<8x8xf32>
      %c0_100 = arith.constant 0 : index
      %c8 = arith.constant 8 : index
      %171 = vector.load %arg6[%c0_100, %c8] : memref<8x128xf32, #tpu.memory_space<vmem>>, vector<8x8xf32>
      tpu.vector_store %arg6[%c0_100, %c8], %170 {strides = array<i32>} : memref<8x128xf32, #tpu.memory_space<vmem>>, vector<8x8xf32>,
      %c2_101 = arith.constant 2 : index
      %c0_102 = arith.constant 0 : index
      %c0_103 = arith.constant 0 : index
      %172 = vector.load %arg8[%c2_101, %c0_102, %c0_103] : memref<4x8x9xf32, #tpu.memory_space<vmem>>, vector<1x8x9xf32>
      %173 = vector.shape_cast %172 : vector<1x8x9xf32> to vector<8x9xf32>
      %174 = vector.extract_strided_slice %173 {offsets = [0, 0], sizes = [8, 8], strides = [1, 1]} : vector<8x9xf32> to vector<8x8xf32>
      %175 = vector.extract_strided_slice %173 {offsets = [0, 8], sizes = [8, 1], strides = [1, 1]} : vector<8x9xf32> to vector<8x1xf32>
      %176 = tpu.reciprocal %175 {approx = true} : vector<8x1xf32> -> vector<8x1xf32>
      %177 = arith.mulf %175, %176 : vector<8x1xf32>
      %cst_104 = arith.constant 2.000000e+00 : f32
      %178 = vector.broadcast %cst_104 : f32 to vector<8x1xf32>
      %179 = arith.subf %178, %177 : vector<8x1xf32>
      %180 = arith.mulf %176, %179 : vector<8x1xf32>
      %181 = vector.broadcast %180 : vector<8x1xf32> to vector<8x8xf32>
      %182 = arith.mulf %174, %181 : vector<8x8xf32>
      %c0_105 = arith.constant 0 : index
      %c16 = arith.constant 16 : index
      %183 = vector.load %arg6[%c0_105, %c16] : memref<8x128xf32, #tpu.memory_space<vmem>>, vector<8x8xf32>
      tpu.vector_store %arg6[%c0_105, %c16], %182 {strides = array<i32>} : memref<8x128xf32, #tpu.memory_space<vmem>>, vector<8x8xf32>,
      %c3_106 = arith.constant 3 : index
      %c0_107 = arith.constant 0 : index
      %c0_108 = arith.constant 0 : index
      %184 = vector.load %arg8[%c3_106, %c0_107, %c0_108] : memref<4x8x9xf32, #tpu.memory_space<vmem>>, vector<1x8x9xf32>
      %185 = vector.shape_cast %184 : vector<1x8x9xf32> to vector<8x9xf32>
      %186 = vector.extract_strided_slice %185 {offsets = [0, 0], sizes = [8, 8], strides = [1, 1]} : vector<8x9xf32> to vector<8x8xf32>
      %187 = vector.extract_strided_slice %185 {offsets = [0, 8], sizes = [8, 1], strides = [1, 1]} : vector<8x9xf32> to vector<8x1xf32>
      %188 = tpu.reciprocal %187 {approx = true} : vector<8x1xf32> -> vector<8x1xf32>
      %189 = arith.mulf %187, %188 : vector<8x1xf32>
      %cst_109 = arith.constant 2.000000e+00 : f32
      %190 = vector.broadcast %cst_109 : f32 to vector<8x1xf32>
      %191 = arith.subf %190, %189 : vector<8x1xf32>
      %192 = arith.mulf %188, %191 : vector<8x1xf32>
      %193 = vector.broadcast %192 : vector<8x1xf32> to vector<8x8xf32>
      %194 = arith.mulf %186, %193 : vector<8x8xf32>
      %c0_110 = arith.constant 0 : index
      %c24 = arith.constant 24 : index
      %195 = vector.load %arg6[%c0_110, %c24] : memref<8x128xf32, #tpu.memory_space<vmem>>, vector<8x8xf32>
      tpu.vector_store %arg6[%c0_110, %c24], %194 {strides = array<i32>} : memref<8x128xf32, #tpu.memory_space<vmem>>, vector<8x8xf32>,
    } else {
    }
    return
  }
  func.func @transform_0(%arg0: i32, %arg1: i32) -> (i32, i32) {
    %c0_i32 = arith.constant 0 : i32
    %c0_i32_0 = arith.constant 0 : i32
    return %arg0, %c0_i32 : i32, i32
  }
  func.func @transform_1(%arg0: i32, %arg1: i32) -> (i32, i32) {
    %c0_i32 = arith.constant 0 : i32
    %c0_i32_0 = arith.constant 0 : i32
    return %c0_i32, %arg1 : i32, i32
  }
  func.func @transform_2(%arg0: i32, %arg1: i32) -> (i32, i32, i32) {
    %c0_i32 = arith.constant 0 : i32
    %c0_i32_0 = arith.constant 0 : i32
    %c0_i32_1 = arith.constant 0 : i32
    return %c0_i32, %arg1, %c0_i32_0 : i32, i32, i32
  }
  func.func @transform_3(%arg0: i32, %arg1: i32) -> (i32, i32) {
    %c0_i32 = arith.constant 0 : i32
    return %arg0, %arg1 : i32, i32
  }
  func.func @transform_4(%arg0: i32, %arg1: i32) -> (i32, i32) {
    %c0_i32 = arith.constant 0 : i32
    %c0_i32_0 = arith.constant 0 : i32
    return %arg0, %c0_i32 : i32, i32
  }
}

</mosaic_0001>

<bundles_post_ra>
// kernel: tpu_custom_call.1
= control target key start
LH: loop header
LB: loop body
LE: loop exit
PB: predicated region body
PF: predicated region fallthrough
CT: control target
= control target key end

     0   :  { %9 = vsyncpa [#allocation5], 0  ;;  %s601_s0 = inlined_call_operand.vmem [shape: f32[8,4], index: 0, kind: input, shape index: {}]   ;;  %s602_s1 = inlined_call_operand.vmem [shape: f32[4,8], index: 1, kind: input, shape index: {}]   ;;  %s603_s2 = inlined_call_operand.hbm [shape: bf16[4,8,9], index: 2, kind: input, shape index: {}]   ;;  %s604_s3 = inlined_call_operand.vmem [shape: s8[8,8], index: 3, kind: input, shape index: {}]   ;;  %s605_s4 = inlined_call_operand.hbm [shape: f32[8,128], index: 4, kind: output, shape index: {}]  }
   0x1   :  { %10 = vsyncpa [#allocation6], 0  ;;  %s19_s17 = sshll.u32 %s603_s2, 4  ;;  %s493_s18 = smov [#allocation4]   ;;  %s20_s17 = int_to_ptr.hbm [resolvable:$true] %s19_s17 }
   0x2   :  { %s21_s19 = sshll.u32 %s493_s18, 4  ;;  %s494_s20 = smov 64   ;;  %s22_s19 = int_to_ptr.vmem [resolvable:$true] %s21_s19 }
   0x3   :  { %s495_s21 = smov 4  }
   0x4   :  { %27 = dma.hbm_to_vmem [thread:$0]  %s20_s17, 256, %s22_s19, [#allocation5], %s494_s20, %s494_s20, %s495_s21  }
   0x5   :  { %489 = dma.done.wait [#allocation5], 256  }
   0x6   :  { %490 = vsyncadd [#allocation5], 4294967040  ;;  %v496_v0 = vmov 2   ;;  %v497_v1 = vmov 1   ;;  %v498_v2 = vmov 0   ;;  %v179_v3 = vld [vmem:[%s601_s0] sm:$0xff] }
   0x7   :  { %404 = vset.pattern.permute.xlu0 %v496_v0  ;;  %406 = vset.pattern.permute.xlu1 %v497_v1  ;;  %v499_v4 = vmov 3   ;;  %vm39_vm0 = vcmask 7168   ;;  %v49_v5 = vld [vmem:[%s604_s3] sm:$0x3]  ;;  %v500_v6 = vmov -inf   ;;  %vm67_vm1 = vcmask 64512  }
   0x8   :  { %408 = vset.pattern.permute.xlu2 %v498_v2  ;;  %183 = vperm.xlu0 %404, %v179_v3   ;;  %42 = vst.msk [vmem:[#allocation2 + $0x10] sm:$0xff] %vm39_vm0, %v500_v6  ;;  %v50_v7 = vunpack.c.0.s8 %v49_v5  ;;  %v413_v9 = vld [vmem:[%s602_s1 + $0x2] ss:$0 sm:$0xff]  ;;  %v414_v10 = vld [vmem:[%s602_s1 + $0x1] ss:$0 sm:$0xff]  ;;  %vm95_vm2 = vcmask 1043456  }
   0x9   :  { %121 = vperm.xlu1 %406, %v179_v3   ;;  %40 = vst.msk [vmem:[#allocation2] sm:$0xff] %vm39_vm0, %v500_v6  ;;  %v415_v21 = vld [vmem:[%s602_s1 + $0x3] ss:$0 sm:$0xff]  ;;  %v416_v22 = vld [vmem:[%s602_s1] ss:$0 sm:$0xff]  ;;  %vm44_vm3 = vcmask 72704  }
   0xa   :  { %41 = vst.msk [vmem:[#allocation2 + $0x8] sm:$0xff] %vm39_vm0, %v500_v6  ;;  %v51_v8 = vcvt.s32.f32 %v50_v7  ;;  %v218_v63 = vld [vmem:[#allocation4 + $0x8] sm:$0xf]  ;;  %v280_v1 = vld [vmem:[#allocation4 + $0xc] sm:$0xf]  ;;  %s503_s1 = smov 8  }
   0xb   :  { %43 = vst.msk [vmem:[#allocation2 + $0x18] sm:$0xff] %vm39_vm0, %v500_v6  ;;  %v223_v0 = vsel %vm95_vm2, %v218_v63, 0  ;;  %s504_s5 = smov 24   ;;  %s505_s6 = smov 16   ;;  %vm333_vm4 = vcmask 130112   ;;  %vm350_vm5 = vcmask 195712  }
   0xc   :  { %v52_v11 = vsub.f32 1.0, %v51_v8  ;;  %232 = vmatpush.bf16.msra.mxu2 %v223_v0  ;;  %s506_s7 = smov [#allocation7]   ;;  %s376_s11 = sshll.u32 %s605_s4, 4  ;;  %vm367_vm6 = vcmask 261312   ;;  %s377_s11 = int_to_ptr.hbm [resolvable:$true] %s376_s11 }
   0xd   :  { %s374_s8 = sshll.u32 %s506_s7, 4  ;;  %s375_s8 = int_to_ptr.vmem [resolvable:$true] %s374_s8 }
   0xe   :  { %v53_v18 = vmul.f32 -1e+30, %v52_v11 }
   0xf   :  { %v192_v39 = vld [vmem:[#allocation2 + $0x10] sm:$0xff] }
  0x10   :  { %405 = vset.pattern.permute.xlu0 %v499_v4  ;;  %v66_v48 = vld [vmem:[#allocation2] sm:$0xff]  ;;  %v501_v4 = vmov 0.0  }
  0x11   :  { %407 = vset.pattern.permute.xlu1 %v498_v2  ;;  %245 = vperm.xlu0 %405, %v179_v3   ;;  %v130_v40 = vld [vmem:[#allocation2 + $0x8] sm:$0xff]  ;;  %47 = vst.msk [vmem:[#allocation3 + $0x10] sm:$0xff] %vm44_vm3, %v501_v4 }
  0x12   :  { %58 = vperm.xlu1 %407, %v179_v3   ;;  %v254_v47 = vld [vmem:[#allocation2 + $0x18] sm:$0xff]  ;;  %v156_v3 = vld [vmem:[#allocation4 + $0x4] sm:$0xf]  ;;  %45 = vst.msk [vmem:[#allocation3] sm:$0xff] %vm44_vm3, %v501_v4 }
  0x13   :  { %v161_v5 = vsel %vm95_vm2, %v156_v3, 0  ;;  %46 = vst.msk [vmem:[#allocation3 + $0x8] sm:$0xff] %vm44_vm3, %v501_v4 }
  0x14   :  { %170 = vmatpush.bf16.msra.mxu1 %v161_v5  ;;  %48 = vst.msk [vmem:[#allocation3 + $0x18] sm:$0xff] %vm44_vm3, %v501_v4 }
  0x19   :  { %409 = vset.pattern.permute.xlu0 %v498_v2  ;;  %v285_v2 = vsel %vm95_vm2, %v280_v1, 0 }
  0x1a   :  { %294 = vmatpush.bf16.msra.mxu3 %v285_v2 }
  0x7a   :  { %v184_v12 = vpop.permute.xlu0 %183 }
  0x7b   :  { %v122_v13 = vpop.permute.xlu1 %121  ;;  %v187_v14 = vadd.f32 %v413_v9, %v184_v12  ;;  %v91_v9 = vld [vmem:[#allocation4] sm:$0xf] }
  0x7c   :  { %v125_v15 = vadd.f32 %v414_v10, %v122_v13  ;;  %v97_v10 = vsel %vm95_vm2, %v91_v9, 0 }
  0x7d   :  { %v188_v16 = vmul.f32 0.01, %v187_v14  ;;  %106 = vmatpush.bf16.msra.mxu0 %v97_v10 }
  0x7e   :  { %v126_v17 = vmul.f32 0.01, %v125_v15 }
  0x7f   :  { %v189_v19 = vmax.f32 %v187_v14, %v188_v16 }
  0x80   :  { %v127_v20 = vmax.f32 %v125_v15, %v126_v17 }
  0x81   :  { %v557_v23 = vadd.f32 %v189_v19, %v53_v18 }
  0x82   :  { %v559_v24 = vadd.f32 %v127_v20, %v53_v18 }
  0x83   :  { %v246_v25 = vpop.permute.xlu0 %245  ;;  %v193_v26 = vsel %vm67_vm1, %v557_v23, -inf }
  0x84   :  { %v131_v27 = vsel %vm67_vm1, %v559_v24, -inf  ;;  %v59_v28 = vpop.permute.xlu1 %58  ;;  %v249_v29 = vadd.f32 %v415_v21, %v246_v25  ;;  %194 = vmax.xlane.f32.xlu2 %v193_v26 }
  0x85   :  { %132 = vmax.xlane.f32.xlu1 %v131_v27  ;;  %v62_v30 = vadd.f32 %v416_v22, %v59_v28 }
  0x86   :  { %v250_v31 = vmul.f32 0.01, %v249_v29 }
  0x87   :  { %v63_v32 = vmul.f32 0.01, %v62_v30 }
  0x88   :  { %v251_v33 = vmax.f32 %v249_v29, %v250_v31  ;;  %v209_v29 = vld [vmem:[#allocation3 + $0x10] sm:$0xff] }
  0x89   :  { %v64_v34 = vmax.f32 %v62_v30, %v63_v32 }
  0x8a   :  { %v565_v35 = vadd.f32 %v251_v33, %v53_v18 }
  0x8b   :  { %v567_v36 = vadd.f32 %v64_v34, %v53_v18  ;;  %v271_v34 = vld [vmem:[#allocation3 + $0x18] sm:$0xff] }
  0x8c   :  { %v255_v37 = vsel %vm67_vm1, %v565_v35, -inf }
  0x8d   :  { %v68_v38 = vsel %vm67_vm1, %v567_v36, -inf  ;;  %256 = vmax.xlane.f32.xlu2 %v255_v37 }
  0x8e   :  { %69 = vmax.xlane.f32.xlu0 %v68_v38 }
  0xf7   :  { %v195_v41 = vpop.xlane.xlu2 %194 }
  0xf8   :  { %v133_v42 = vpop.xlane.xlu1 %132  ;;  %v196_v43 = vmax.f32 %v192_v39, %v195_v41 }
  0xf9   :  { %v134_v44 = vmax.f32 %v130_v40, %v133_v42 }
  0xfa   :  { %240 = vst.msk [vmem:[#allocation2 + $0x10] sm:$0xff] %vm39_vm0, %v196_v43  ;;  %202 = vperm.xlu2 %408, %v196_v43   ;;  %v197_v56 = vsub.f32 %v192_v39, %v196_v43 }
  0xfb   :  { %v135_v45 = vsub.f32 %v130_v40, %v134_v44  ;;  %178 = vst.msk [vmem:[#allocation2 + $0x8] sm:$0xff] %vm39_vm0, %v134_v44 }
  0xfc   :  { %v198_v58 = vmul.f32 1.442695, %v197_v56 }
  0xfd   :  { %v136_v46 = vmul.f32 1.442695, %v135_v45 }
  0xff   :  { %417 = vpow2.f32 %v136_v46  ;;  %v83_v46 = vld [vmem:[#allocation3] sm:$0xff] }
 0x100   :  { %v257_v49 = vpop.xlane.xlu2 %256 }
 0x101   :  { %v70_v50 = vpop.xlane.xlu0 %69  ;;  %v258_v51 = vmax.f32 %v254_v47, %v257_v49 }
 0x102   :  { %v71_v52 = vmax.f32 %v66_v48, %v70_v50 }
 0x103   :  { %v259_v53 = vsub.f32 %v254_v47, %v258_v51  ;;  %302 = vst.msk [vmem:[#allocation2 + $0x18] sm:$0xff] %vm39_vm0, %v258_v51  ;;  %264 = vperm.xlu2 %408, %v258_v51  }
 0x104   :  { %116 = vst.msk [vmem:[#allocation2] sm:$0xff] %vm39_vm0, %v71_v52  ;;  %v72_v59 = vsub.f32 %v66_v48, %v71_v52 }
 0x105   :  { %v418_v54 = vpop.eup %417  ;;  %v260_v55 = vmul.f32 1.442695, %v259_v53 }
 0x106   :  { %150 = vperm.xlu1 %407, %v418_v54   ;;  %v73_v60 = vmul.f32 1.442695, %v72_v59 }
 0x107   :  { %419 = vpow2.f32 %v260_v55 }
 0x108   :  { %421 = vpow2.f32 %v198_v58 }
 0x109   :  { %423 = vpow2.f32 %v73_v60 }
 0x10b   :  { %140 = vperm.xlu2 %408, %v134_v44  }
 0x10d   :  { %v420_v57 = vpop.eup %419 }
 0x10e   :  { %274 = vperm.xlu0 %409, %v420_v57   ;;  %v422_v61 = vpop.eup %421 }
 0x10f   :  { %v424_v62 = vpop.eup %423 }
 0x113   :  { %77 = vperm.xlu2 %408, %v71_v52  }
 0x11b   :  { %212 = vperm.xlu2 %408, %v422_v61  }
 0x123   :  { %86 = vperm.xlu2 %408, %v424_v62  }
 0x154   :  { %v203_v6 = vpop.permute.xlu2 %202 }
 0x155   :  { %v205_v7 = vsub.f32 %v557_v23, %v203_v6 }
 0x157   :  { %v206_v8 = vmul.f32 1.442695, %v205_v7 }
 0x159   :  { %425 = vpow2.f32 %v206_v8 }
 0x15d   :  { %v265_v11 = vpop.permute.xlu2 %264 }
 0x15e   :  { %v267_v12 = vsub.f32 %v565_v35, %v265_v11 }
 0x15f   :  { %v426_v13 = vpop.eup %425 }
 0x160   :  { %v216_v14 = vpack.c.bf16 %v426_v13, %v426_v13  ;;  %v268_v15 = vmul.f32 1.442695, %v267_v12 }
 0x162   :  { %427 = vpow2.f32 %v268_v15  ;;  %388 = vmatmul.msk.bf16.vlgmr.msra.gmra.mxu2 %vm67_vm1, %v216_v14 }
 0x165   :  { %v141_v16 = vpop.permute.xlu2 %140 }
 0x166   :  { %v143_v17 = vsub.f32 %v559_v24, %v141_v16  ;;  %v502_v24 = vmov 8  }
 0x167   :  { %411 = vset.pattern.permute.xlu1 %v502_v24  ;;  %410 = vset.pattern.permute.xlu2 %v502_v24 }
 0x168   :  { %v428_v18 = vpop.eup %427  ;;  %v144_v19 = vmul.f32 1.442695, %v143_v17  ;;  %412 = vset.pattern.permute.xlu0 %v502_v24 }
 0x169   :  { %v278_v20 = vpack.c.bf16 %v428_v18, %v428_v18 }
 0x16a   :  { %429 = vpow2.f32 %v144_v19 }
 0x16b   :  { %389 = vmatmul.msk.bf16.vlgmr.msra.gmra.mxu3 %vm67_vm1, %v278_v20 }
 0x16d   :  { %v78_v21 = vpop.permute.xlu2 %77 }
 0x16e   :  { %v80_v22 = vsub.f32 %v567_v36, %v78_v21  ;;  %v147_v36 = vld [vmem:[#allocation3 + $0x8] sm:$0xff] }
 0x170   :  { %v430_v23 = vpop.eup %429  ;;  %v81_v25 = vmul.f32 1.442695, %v80_v22 }
 0x171   :  { %v154_v26 = vpack.c.bf16 %v430_v23, %v430_v23 }
 0x172   :  { %431 = vpow2.f32 %v81_v25 }
 0x173   :  { %387 = vmatmul.msk.bf16.vlgmr.msra.gmra.mxu1 %vm67_vm1, %v154_v26 }
 0x175   :  { %v213_v30 = vpop.permute.xlu2 %212 }
 0x176   :  { %v215_v31 = vmul.f32 %v213_v30, %v209_v29 }
 0x178   :  { %v432_v27 = vpop.eup %431  ;;  %v151_v37 = vpop.permute.xlu1 %150 }
 0x179   :  { %v90_v28 = vpack.c.bf16 %v432_v27, %v432_v27  ;;  %v153_v41 = vmul.f32 %v151_v37, %v147_v36 }
 0x17b   :  { %386 = vmatmul.msk.bf16.vlgmr.msra.gmra.mxu0 %vm67_vm1, %v90_v28 }
 0x17d   :  { %v87_v47 = vpop.permute.xlu2 %86 }
 0x17e   :  { %v89_v50 = vmul.f32 %v87_v47, %v83_v46 }
 0x180   :  { %v275_v35 = vpop.permute.xlu0 %274 }
 0x181   :  { %v277_v38 = vmul.f32 %v275_v35, %v271_v34 }
 0x1e5   :  { %v234_v32 = vpop.f32.mrf.mxu2 }
 0x1e6   :  { %v238_v33 = vadd.f32 %v234_v32, %v215_v31 }
 0x1e8   :  { %239 = vst.msk [vmem:[#allocation3 + $0x10] sm:$0xff] %vm44_vm3, %v238_v33 }
 0x1ed   :  { %v236_v39 = vpop.f32.mrf.mxu2 }
 0x1ee   :  { %v296_v40 = vpop.f32.mrf.mxu3 }
 0x1ef   :  { %v300_v42 = vadd.f32 %v296_v40, %v277_v38  ;;  %v335_v43 = vld [vmem:[#allocation3 + $0x10] sm:$0xff] }
 0x1f0   :  { %v172_v44 = vpop.f32.mrf.mxu1  ;;  %433 = vrcp.f32 %v335_v43 }
 0x1f1   :  { %301 = vst.msk [vmem:[#allocation3 + $0x18] sm:$0xff] %vm44_vm3, %v300_v42  ;;  %v176_v45 = vadd.f32 %v172_v44, %v153_v41 }
 0x1f3   :  { %177 = vst.msk [vmem:[#allocation3 + $0x8] sm:$0xff] %vm44_vm3, %v176_v45 }
 0x1f6   :  { %v434_v48 = vpop.eup %433  ;;  %v298_v49 = vpop.f32.mrf.mxu3 }
 0x1f7   :  { %v337_v51 = vmul.f32 %v434_v48, %v335_v43 }
 0x1f8   :  { %v108_v52 = vpop.f32.mrf.mxu0  ;;  %v174_v53 = vpop.f32.mrf.mxu1  ;;  %v352_v57 = vld [vmem:[#allocation3 + $0x18] sm:$0xff] }
 0x1f9   :  { %v112_v54 = vadd.f32 %v108_v52, %v89_v50  ;;  %v338_v55 = vsub.f32 2.0, %v337_v51 }
 0x1fa   :  { %v318_v56 = vld [vmem:[#allocation3 + $0x8] sm:$0xff] }
 0x1fb   :  { %114 = vst.msk [vmem:[#allocation3] sm:$0xff] %vm44_vm3, %v112_v54  ;;  %v339_v58 = vmul.f32 %v434_v48, %v338_v55  ;;  %435 = vrcp.f32 %v318_v56 }
 0x1fc   :  { %437 = vrcp.f32 %v352_v57 }
 0x1fd   :  { %342 = vperm.xlu1 %411, %v339_v58  }
 0x200   :  { %v110_v59 = vpop.f32.mrf.mxu0 }
 0x201   :  { %v436_v60 = vpop.eup %435 }
 0x202   :  { %v320_v61 = vmul.f32 %v436_v60, %v318_v56  ;;  %v306_v62 = vld [vmem:[#allocation3] sm:$0xff]  ;;  %v438_v63 = vpop.eup %437 }
 0x203   :  { %439 = vrcp.f32 %v306_v62  ;;  %v354_v2 = vmul.f32 %v438_v63, %v352_v57 }
 0x204   :  { %v321_v0 = vsub.f32 2.0, %v320_v61 }
 0x205   :  { %v355_v4 = vsub.f32 2.0, %v354_v2 }
 0x206   :  { %v322_v1 = vmul.f32 %v436_v60, %v321_v0 }
 0x207   :  { %v356_v7 = vmul.f32 %v438_v63, %v355_v4 }
 0x208   :  { %325 = vperm.xlu2 %410, %v322_v1  }
 0x209   :  { %v440_v3 = vpop.eup %439 }
 0x20a   :  { %v308_v5 = vmul.f32 %v440_v3, %v306_v62 }
 0x20c   :  { %v309_v6 = vsub.f32 2.0, %v308_v5 }
 0x20e   :  { %v310_v8 = vmul.f32 %v440_v3, %v309_v6 }
 0x210   :  { %359 = vperm.xlu2 %410, %v356_v7   ;;  %313 = vperm.xlu1 %411, %v310_v8  }
 0x262   :  { %v326_v9 = vpop.permute.xlu2 %325 }
 0x263   :  { %v328_v10 = vmul.f32 %v326_v9, %v318_v56 }
 0x265   :  { %330 = vrot.lane.b32.xlu2 %v328_v10, %s503_s1 }
 0x26a   :  { %v360_v11 = vpop.permute.xlu2 %359 }
 0x26b   :  { %v362_v12 = vmul.f32 %v360_v11, %v352_v57 }
 0x26d   :  { %364 = vrot.lane.b32.xlu2 %v362_v12, %s504_s5 }
 0x26f   :  { %v343_v13 = vpop.permute.xlu1 %342 }
 0x270   :  { %v345_v14 = vmul.f32 %v343_v13, %v335_v43 }
 0x272   :  { %347 = vrot.lane.b32.xlu1 %v345_v14, %s505_s6 }
 0x282   :  { %v314_v15 = vpop.permute.xlu1 %313 }
 0x283   :  { %v316_v16 = vmul.f32 %v314_v15, %v306_v62 }
 0x285   :  { %317 = vst.msk [vmem:[#allocation7] sm:$0xff] %vm67_vm1, %v316_v16 }
 0x2bf   :  { %v331_v17 = vpop.permute.xlu2 %330 }
 0x2c0   :  { %334 = vst.msk [vmem:[#allocation7] sm:$0xff] %vm333_vm4, %v331_v17 }
 0x2c7   :  { %v365_v19 = vpop.permute.xlu2 %364 }
 0x2e4   :  { %v348_v18 = vpop.permute.xlu1 %347 }
 0x2e5   :  { %351 = vst.msk [vmem:[#allocation7] sm:$0xff] %vm350_vm5, %v348_v18 }
 0x2e6   :  { %368 = vst.msk [vmem:[#allocation7] sm:$0xff] %vm367_vm6, %v365_v19 }
 0x2e7   :  { %379 = dma.vmem_to_hbm [thread:$0]  %s375_s8, 128, %s377_s11, [#allocation6]  }
 0x2e8   :  { %491 = dma.done.wait [#allocation6], 128  }
 0x2e9   :  { %492 = vsyncadd [#allocation6], 4294967168 }
 0x2ea   :  { %384 = vsyncpa [#allocation5], 1 }
 0x2eb   :  { %385 = vsyncpa [#allocation6], 1 }

</bundles_post_ra>
